<compile_context>
chip_gen: v5e
topology: v5e:2x2
jax: 0.10.0
libtpu: 0.0.40
codegen_flags: <defaults>
</compile_context>

<pallas_src>
import jax
import jax.numpy as jnp
from jax.experimental import pallas as pl
from jax.experimental.pallas import tpu as pltpu

INPUT_SIZE = 784      # K = 6*128 + 16; ragged K tail accepted knowingly —
                      # padding x to 896 would cost an extra HBM round-trip.
HIDDEN = 50
NUM_CLASSES = 10
HIDDEN_P = 128        # hidden dim padded to lane width
OUT_P = 128           # output dim padded to lane width
DEF_TB = 512          # batch tile: 2 x (512*784*2B) x-buffers + weights << VMEM
                      # even under v7x's 64 MiB budget (no vmem_limit override needed)


def mlp_kernel(x_ref, w1_ref, b1_ref, w2_ref, b2_ref, o_ref):
    # fc1 on the MXU, f32 accumulation.
    h = jnp.dot(x_ref[...], w1_ref[...], preferred_element_type=jnp.float32)
    # Bias + ReLU in f32 on the VPU; padded lanes stay exactly 0 after ReLU.
    h = jnp.maximum(h + b1_ref[...], 0.0)
    # fc2: cast activations back to the weight dtype for the MXU, f32 acc.
    y = jnp.dot(h.astype(w2_ref.dtype), w2_ref[...],
                preferred_element_type=jnp.float32) + b2_ref[...]
    o_ref[...] = y.astype(o_ref.dtype)


def nn_forward(x, w1, b1, w2, b2, *, tb=DEF_TB):
    """x: [B, 784] float. Weights already padded to lane width:
       w1 [784,128] bf16, b1 [1,128] f32, w2 [128,128] bf16, b2 [1,128] f32."""
    B = x.shape[0]
    x = x.astype(jnp.bfloat16)                 # halve HBM bytes moved for x

    TB = min(tb, pl.cdiv(B, 8) * 8)            # batch tile, multiple of 8
    Bp = pl.cdiv(B, TB) * TB
    if Bp != B:
        x = jnp.pad(x, ((0, Bp - B), (0, 0)))

    out = pl.pallas_call(
        mlp_kernel,
        out_shape=jax.ShapeDtypeStruct((Bp, OUT_P), jnp.float32),
        grid_spec=pl.GridSpec(
            grid=(Bp // TB,),
            in_specs=[
                pl.BlockSpec((TB, INPUT_SIZE), lambda i: (i, 0)),      # x: tiled
                pl.BlockSpec((INPUT_SIZE, HIDDEN_P), lambda i: (0, 0)),  # resident
                pl.BlockSpec((1, HIDDEN_P), lambda i: (0, 0)),
                pl.BlockSpec((HIDDEN_P, OUT_P), lambda i: (0, 0)),
                pl.BlockSpec((1, OUT_P), lambda i: (0, 0)),
            ],
            out_specs=pl.BlockSpec((TB, OUT_P), lambda i: (i, 0)),
        ),
        compiler_params=pltpu.CompilerParams(
            # Independent batch tiles -> shard across v7x's two TensorCores.
            dimension_semantics=("parallel",),
        ),
    )(x, w1, b1, w2, b2)

    return out[:B, :NUM_CLASSES]


def init_params(key):
    """PyTorch-style Linear init (uniform fan-in), stored as [in, out],
    zero-padded to lane-width feature dims. Weights bf16, biases f32."""
    k1, k2, k3, k4 = jax.random.split(key, 4)
    bound1 = 1.0 / (INPUT_SIZE ** 0.5)
    bound2 = 1.0 / (HIDDEN ** 0.5)
    w1 = jax.random.uniform(k1, (INPUT_SIZE, HIDDEN), jnp.float32, -bound1, bound1)
    b1 = jax.random.uniform(k2, (HIDDEN,), jnp.float32, -bound1, bound1)
    w2 = jax.random.uniform(k3, (HIDDEN, NUM_CLASSES), jnp.float32, -bound2, bound2)
    b2 = jax.random.uniform(k4, (NUM_CLASSES,), jnp.float32, -bound2, bound2)

    w1p = jnp.zeros((INPUT_SIZE, HIDDEN_P), jnp.bfloat16).at[:, :HIDDEN].set(
        w1.astype(jnp.bfloat16))
    b1p = jnp.zeros((1, HIDDEN_P), jnp.float32).at[0, :HIDDEN].set(b1)
    w2p = jnp.zeros((HIDDEN_P, OUT_P), jnp.bfloat16).at[:HIDDEN, :NUM_CLASSES].set(
        w2.astype(jnp.bfloat16))
    b2p = jnp.zeros((1, OUT_P), jnp.float32).at[0, :NUM_CLASSES].set(b2)
    return (w1p, b1p, w2p, b2p), (w1, b1, w2, b2)


if __name__ == "__main__":
    key = jax.random.PRNGKey(0)
    kx, kp = jax.random.split(key)
    B = 64
    x = jax.random.normal(kx, (B, INPUT_SIZE), dtype=jnp.float32)
    (w1p, b1p, w2p, b2p), (w1, b1, w2, b2) = init_params(kp)

    out = jax.block_until_ready(nn_forward(x, w1p, b1p, w2p, b2p))
    print("X SHAPE %s" % str(out.shape))   # mirrors the PyTorch forward's print

    # Reference with the same bf16-input / f32-accumulation semantics.
    xb = x.astype(jnp.bfloat16)
    w1b = w1.astype(jnp.bfloat16)
    w2b = w2.astype(jnp.bfloat16)
    h_ref = jnp.maximum(
        jnp.dot(xb, w1b, preferred_element_type=jnp.float32) + b1, 0.0)
    ref = jnp.dot(h_ref.astype(jnp.bfloat16), w2b,
                  preferred_element_type=jnp.float32) + b2

    assert out.shape == (B, NUM_CLASSES)
    assert jnp.allclose(out, ref, atol=1e-2, rtol=1e-2), \
        float(jnp.max(jnp.abs(out - ref)))

    print("KERNEL_OK")
</pallas_src>

<mosaic_0001>
module attributes {stable_mosaic.version = 11 : i64} {
  func.func @mlp_kernel(%arg0: i32, %arg1: memref<64x784xbf16, #tpu.memory_space<vmem>>, %arg2: memref<784x128xbf16, #tpu.memory_space<vmem>>, %arg3: memref<1x128xf32, #tpu.memory_space<vmem>>, %arg4: memref<128x128xbf16, #tpu.memory_space<vmem>>, %arg5: memref<1x128xf32, #tpu.memory_space<vmem>>, %arg6: memref<64x128xf32, #tpu.memory_space<vmem>>) attributes {dimension_semantics = [#tpu.dimension_semantics<parallel>], iteration_bounds = array<i64: 1>, scalar_prefetch = 0 : i64, scratch_operands = 0 : i64, tpu.core_type = #tpu.core_type<tc>, window_params = [{transform_indices = @transform_0, window_bounds = array<i64: 64, 784>}, {pipeline_mode = #tpu.pipeline_mode<synchronous>, transform_indices = @transform_1, window_bounds = array<i64: 784, 128>}, {pipeline_mode = #tpu.pipeline_mode<synchronous>, transform_indices = @transform_2, window_bounds = array<i64: 1, 128>}, {pipeline_mode = #tpu.pipeline_mode<synchronous>, transform_indices = @transform_3, window_bounds = array<i64: 128, 128>}, {pipeline_mode = #tpu.pipeline_mode<synchronous>, transform_indices = @transform_4, window_bounds = array<i64: 1, 128>}, {transform_indices = @transform_5, window_bounds = array<i64: 64, 128>}]} {
    %c0 = arith.constant 0 : index
    %c0_0 = arith.constant 0 : index
    %0 = vector.load %arg1[%c0, %c0_0] : memref<64x784xbf16, #tpu.memory_space<vmem>>, vector<64x784xbf16>
    %c0_1 = arith.constant 0 : index
    %c0_2 = arith.constant 0 : index
    %1 = vector.load %arg2[%c0_1, %c0_2] : memref<784x128xbf16, #tpu.memory_space<vmem>>, vector<784x128xbf16>
    %cst = arith.constant dense<0.000000e+00> : vector<64x128xf32>
    %2 = tpu.matmul %0, %1, %cst {dimension_numbers = #tpu.dot_dimension_numbers<[1], [0], [0], [1], [0, 0, 1, 1], [], []>} : vector<64x784xbf16>, vector<784x128xbf16>, vector<64x128xf32> -> vector<64x128xf32>
    %c0_3 = arith.constant 0 : index
    %c0_4 = arith.constant 0 : index
    %3 = vector.load %arg3[%c0_3, %c0_4] : memref<1x128xf32, #tpu.memory_space<vmem>>, vector<1x128xf32>
    %4 = vector.broadcast %3 : vector<1x128xf32> to vector<64x128xf32>
    %5 = arith.addf %2, %4 : vector<64x128xf32>
    %cst_5 = arith.constant 0.000000e+00 : f32
    %6 = vector.broadcast %cst_5 : f32 to vector<64x128xf32>
    %7 = arith.maximumf %5, %6 : vector<64x128xf32>
    %8 = arith.truncf %7 : vector<64x128xf32> to vector<64x128xbf16>
    %c0_6 = arith.constant 0 : index
    %c0_7 = arith.constant 0 : index
    %9 = vector.load %arg4[%c0_6, %c0_7] : memref<128x128xbf16, #tpu.memory_space<vmem>>, vector<128x128xbf16>
    %cst_8 = arith.constant dense<0.000000e+00> : vector<64x128xf32>
    %10 = tpu.matmul %8, %9, %cst_8 {dimension_numbers = #tpu.dot_dimension_numbers<[1], [0], [0], [1], [0, 0, 1, 1], [], []>} : vector<64x128xbf16>, vector<128x128xbf16>, vector<64x128xf32> -> vector<64x128xf32>
    %c0_9 = arith.constant 0 : index
    %c0_10 = arith.constant 0 : index
    %11 = vector.load %arg5[%c0_9, %c0_10] : memref<1x128xf32, #tpu.memory_space<vmem>>, vector<1x128xf32>
    %12 = vector.broadcast %11 : vector<1x128xf32> to vector<64x128xf32>
    %13 = arith.addf %10, %12 : vector<64x128xf32>
    %c0_11 = arith.constant 0 : index
    %c0_12 = arith.constant 0 : index
    %14 = vector.load %arg6[%c0_11, %c0_12] : memref<64x128xf32, #tpu.memory_space<vmem>>, vector<64x128xf32>
    tpu.vector_store %arg6[%c0_11, %c0_12], %13 {strides = array<i32>} : memref<64x128xf32, #tpu.memory_space<vmem>>, vector<64x128xf32>,
    return
  }
  func.func @transform_0(%arg0: i32) -> (i32, i32) {
    %c0_i32 = arith.constant 0 : i32
    %c0_i32_0 = arith.constant 0 : i32
    return %arg0, %c0_i32 : i32, i32
  }
  func.func @transform_1(%arg0: i32) -> (i32, i32) {
    %c0_i32 = arith.constant 0 : i32
    %c0_i32_0 = arith.constant 0 : i32
    %c0_i32_1 = arith.constant 0 : i32
    return %c0_i32, %c0_i32_0 : i32, i32
  }
  func.func @transform_2(%arg0: i32) -> (i32, i32) {
    %c0_i32 = arith.constant 0 : i32
    %c0_i32_0 = arith.constant 0 : i32
    %c0_i32_1 = arith.constant 0 : i32
    return %c0_i32, %c0_i32_0 : i32, i32
  }
  func.func @transform_3(%arg0: i32) -> (i32, i32) {
    %c0_i32 = arith.constant 0 : i32
    %c0_i32_0 = arith.constant 0 : i32
    %c0_i32_1 = arith.constant 0 : i32
    return %c0_i32, %c0_i32_0 : i32, i32
  }
  func.func @transform_4(%arg0: i32) -> (i32, i32) {
    %c0_i32 = arith.constant 0 : i32
    %c0_i32_0 = arith.constant 0 : i32
    %c0_i32_1 = arith.constant 0 : i32
    return %c0_i32, %c0_i32_0 : i32, i32
  }
  func.func @transform_5(%arg0: i32) -> (i32, i32) {
    %c0_i32 = arith.constant 0 : i32
    %c0_i32_0 = arith.constant 0 : i32
    return %arg0, %c0_i32 : i32, i32
  }
}

</mosaic_0001>

<bundles_post_ra>
// kernel: tpu_custom_call.1
= control target key start
LH: loop header
LB: loop body
LE: loop exit
PB: predicated region body
PF: predicated region fallthrough
CT: control target
= control target key end

     0   :  { %10 = vsyncpa [#allocation3], 0  ;;  %s1620_s0 = inlined_call_operand.hbm [shape: bf16[64,784], index: 0, kind: input, shape index: {}]   ;;  %s1621_s1 = inlined_call_operand.hbm [shape: bf16[784,128], index: 1, kind: input, shape index: {}]   ;;  %s1622_s2 = inlined_call_operand.vmem [shape: f32[1,128], index: 2, kind: input, shape index: {}]   ;;  %s1623_s3 = inlined_call_operand.hbm [shape: bf16[128,128], index: 3, kind: input, shape index: {}]   ;;  %s1624_s4 = inlined_call_operand.vmem [shape: f32[1,128], index: 4, kind: input, shape index: {}]   ;;  %s1625_s5 = inlined_call_operand.hbm [shape: f32[64,128], index: 5, kind: output, shape index: {}]  }
   0x1   :  { %11 = vsyncpa [#allocation6], 0  ;;  %s30_s20 = sshll.u32 %s1621_s1, 4  ;;  %s31_s20 = int_to_ptr.hbm [resolvable:$true] %s30_s20 }
   0x2   :  { %12 = vsyncpa [#allocation4], 0  ;;  %s1533_s21 = smov [#allocation5]   ;;  %s17_s25 = sshll.u32 %s1620_s0, 4  ;;  %s18_s25 = int_to_ptr.hbm [resolvable:$true] %s17_s25 }
   0x3   :  { %s32_s22 = sshll.u32 %s1533_s21, 4  ;;  %s1534_s26 = smov 64   ;;  %s33_s22 = int_to_ptr.vmem [resolvable:$true] %s32_s22 }
   0x4   :  { %s1535_s27 = smov 4   ;;  %s1536_s28 = smov [#allocation2]  }
   0x5   :  { %38 = dma.hbm_to_vmem [thread:$0]  %s31_s20, 6272, %s33_s22, [#allocation6], %s1534_s26, %s1534_s26, %s1535_s27  }
   0x6   :  { %s19_s29 = sshll.u32 %s1536_s28, 4  ;;  %s1537_s30 = smov 448   ;;  %s20_s29 = int_to_ptr.vmem [resolvable:$true] %s19_s29 }
   0x7   :  { %s1538_s6 = smov 28   ;;  %s45_s8 = sshll.u32 %s1623_s3, 4  ;;  %s46_s8 = int_to_ptr.hbm [resolvable:$true] %s45_s8 }
   0x8   :  { %25 = dma.hbm_to_vmem [thread:$0]  %s18_s25, 3584, %s20_s29, [#allocation3], %s1537_s30, %s1537_s30, %s1538_s6  }
   0x9   :  { %s1539_s9 = smov [#allocation7]  }
   0xa   :  { %s47_s10 = sshll.u32 %s1539_s9, 4  ;;  %s48_s10 = int_to_ptr.vmem [resolvable:$true] %s47_s10 }
   0xb   :  { %53 = dma.hbm_to_vmem [thread:$0]  %s46_s8, 1024, %s48_s10, [#allocation6], %s1534_s26, %s1534_s26, %s1535_s27  }
   0xc   :  { %1527 = dma.done.wait [#allocation3], 3584  }
   0xd   :  { %1528 = vsyncadd [#allocation3], 4294963712 }
   0xe   :  { %1529 = dma.done.wait [#allocation6], 7296  }
   0xf   :  { %1530 = vsyncadd [#allocation6], 4294960000  ;;  %v1369_v0 = vld [vmem:[#allocation5 + $0x38] sm:$0xff]  ;;  %v1368_v4 = vld [vmem:[#allocation5 + $0x30] sm:$0xff]  ;;  %vm637_vm0 = vcmask 130048   ;;  %s976_s15 = sshll.u32 %s1625_s5, 4  ;;  %s977_s15 = int_to_ptr.hbm [resolvable:$true] %s976_s15 }
  0x10   :  { %v1377_v1 = vld [vmem:[#allocation5 + $0x78] sm:$0xff]  ;;  %650 = vmatpush.bf16.msra.mxu0 %v1369_v0  ;;  %v1376_v5 = vld [vmem:[#allocation5 + $0x70] sm:$0xff]  ;;  %v1367_v8 = vld [vmem:[#allocation5 + $0x28] sm:$0xff]  ;;  %s1541_s16 = smov 128   ;;  %s1542_s17 = smov 8  }
  0x11   :  { %v1385_v2 = vld [vmem:[#allocation5 + $0xb8] sm:$0xff]  ;;  %679 = vmatpush.bf16.msra.mxu1 %v1377_v1  ;;  %v1384_v6 = vld [vmem:[#allocation5 + $0xb0] sm:$0xff]  ;;  %v1375_v9 = vld [vmem:[#allocation5 + $0x68] sm:$0xff] }
  0x12   :  { %v1393_v3 = vld [vmem:[#allocation5 + $0xf8] sm:$0xff]  ;;  %708 = vmatpush.bf16.msra.mxu2 %v1385_v2  ;;  %v1392_v7 = vld [vmem:[#allocation5 + $0xf0] sm:$0xff]  ;;  %v1383_v10 = vld [vmem:[#allocation5 + $0xa8] sm:$0xff] }
  0x13   :  { %737 = vmatpush.bf16.msra.mxu3 %v1393_v3  ;;  %v1391_v11 = vld [vmem:[#allocation5 + $0xe8] sm:$0xff]  ;;  %v1366_v12 = vld [vmem:[#allocation5 + $0x20] sm:$0xff]  ;;  %v1365_v16 = vld [vmem:[#allocation5 + $0x18] sm:$0xff] }
  0x14   :  { %651 = vmatpush.bf16.msra.mxu0 %v1368_v4  ;;  %v1374_v13 = vld [vmem:[#allocation5 + $0x60] sm:$0xff]  ;;  %v1373_v17 = vld [vmem:[#allocation5 + $0x58] sm:$0xff]  ;;  %v1364_v20 = vld [vmem:[#allocation5 + $0x10] sm:$0xff] }
  0x15   :  { %680 = vmatpush.bf16.msra.mxu1 %v1376_v5  ;;  %v1382_v14 = vld [vmem:[#allocation5 + $0xa0] sm:$0xff]  ;;  %v1381_v18 = vld [vmem:[#allocation5 + $0x98] sm:$0xff]  ;;  %v1372_v21 = vld [vmem:[#allocation5 + $0x50] sm:$0xff] }
  0x16   :  { %709 = vmatpush.bf16.msra.mxu2 %v1384_v6  ;;  %v1390_v15 = vld [vmem:[#allocation5 + $0xe0] sm:$0xff]  ;;  %v1389_v19 = vld [vmem:[#allocation5 + $0xd8] sm:$0xff]  ;;  %v1380_v22 = vld [vmem:[#allocation5 + $0x90] sm:$0xff] }
  0x17   :  { %738 = vmatpush.bf16.msra.mxu3 %v1392_v7  ;;  %v1388_v23 = vld [vmem:[#allocation5 + $0xd0] sm:$0xff]  ;;  %v1363_v24 = vld [vmem:[#allocation5 + $0x8] sm:$0xff]  ;;  %v1362_v28 = vld [vmem:[#allocation5] sm:$0xff] }
  0x18   :  { %652 = vmatpush.bf16.msra.mxu0 %v1367_v8  ;;  %v1371_v25 = vld [vmem:[#allocation5 + $0x48] sm:$0xff]  ;;  %v1370_v29 = vld [vmem:[#allocation5 + $0x40] sm:$0xff]  ;;  %v1337_v33 = vld [vmem:[#allocation2 + $0x18] sm:$0xf0] }
  0x19   :  { %681 = vmatpush.bf16.msra.mxu1 %v1375_v9  ;;  %v1379_v26 = vld [vmem:[#allocation5 + $0x88] sm:$0xff]  ;;  %v1378_v30 = vld [vmem:[#allocation5 + $0x80] sm:$0xff]  ;;  %v1401_v41 = vld [vmem:[#allocation5 + $0x138] sm:$0xff] }
  0x1a   :  { %710 = vmatpush.bf16.msra.mxu2 %v1383_v10  ;;  %v1387_v27 = vld [vmem:[#allocation5 + $0xc8] sm:$0xff]  ;;  %v1386_v31 = vld [vmem:[#allocation5 + $0xc0] sm:$0xff]  ;;  %v1409_v46 = vld [vmem:[#allocation5 + $0x178] sm:$0xff] }
  0x1b   :  { %739 = vmatpush.bf16.msra.mxu3 %v1391_v11  ;;  %v992_v32 = vld [vmem:[#allocation2] sm:$0xf]  ;;  %v1334_v34 = vld [vmem:[#allocation2 + $0x4] sm:$0xf]  ;;  %v1000_v36 = vld [vmem:[#allocation2 + $0x8] sm:$0xf] }
  0x1c   :  { %653 = vmatpush.bf16.msra.mxu0 %v1366_v12  ;;  %v994_v35 = vld [vmem:[#allocation2 + $0x1c] sm:$0xf0]  ;;  %v1338_v37 = vld [vmem:[#allocation2 + $0x20] sm:$0xf0]  ;;  %v1335_v38 = vld [vmem:[#allocation2 + $0xc] sm:$0xf]  ;;  %v993_v42 = vor.u32 %v1337_v33, %v992_v32 }
  0x1d   :  { %682 = vmatpush.bf16.msra.mxu1 %v1374_v13  ;;  %v1002_v39 = vld [vmem:[#allocation2 + $0x24] sm:$0xf0]  ;;  %v1410_v40 = vld [vmem:[#allocation5 + $0x180] sm:$0xff]  ;;  %v997_v43 = vor.u32 %v1334_v34, %v994_v35  ;;  %v1001_v44 = vor.u32 %v1338_v37, %v1000_v36  ;;  %v1400_v47 = vld [vmem:[#allocation5 + $0x130] sm:$0xff] }
  0x1e   :  { %711 = vmatpush.bf16.msra.mxu2 %v1382_v14  ;;  %v1005_v45 = vor.u32 %v1335_v38, %v1002_v39  ;;  %v1408_v48 = vld [vmem:[#allocation5 + $0x170] sm:$0xff]  ;;  %v1399_v49 = vld [vmem:[#allocation5 + $0x128] sm:$0xff]  ;;  %v1398_v51 = vld [vmem:[#allocation5 + $0x120] sm:$0xff] }
  0x1f   :  { %740 = vmatpush.bf16.msra.mxu3 %v1390_v15  ;;  %v1407_v50 = vld [vmem:[#allocation5 + $0x168] sm:$0xff]  ;;  %v1020_v52 = vld [vmem:[#allocation2 + $0x38] sm:$0xf]  ;;  %v1344_v53 = vld [vmem:[#allocation2 + $0x50] sm:$0xf0] }
  0x20   :  { %654 = vmatpush.bf16.msra.mxu0 %v1365_v16  ;;  %v1341_v54 = vld [vmem:[#allocation2 + $0x3c] sm:$0xf]  ;;  %v1022_v55 = vld [vmem:[#allocation2 + $0x54] sm:$0xf0]  ;;  %v1028_v56 = vld [vmem:[#allocation2 + $0x40] sm:$0xf]  ;;  %v1021_v62 = vor.u32 %v1344_v53, %v1020_v52 }
  0x21   :  { %683 = vmatpush.bf16.msra.mxu1 %v1373_v17  ;;  %v1345_v57 = vld [vmem:[#allocation2 + $0x58] sm:$0xf0]  ;;  %v1342_v58 = vld [vmem:[#allocation2 + $0x44] sm:$0xf]  ;;  %v1030_v59 = vld [vmem:[#allocation2 + $0x5c] sm:$0xf0]  ;;  %v1025_v63 = vor.u32 %v1341_v54, %v1022_v55 }
  0x22   :  { %712 = vmatpush.bf16.msra.mxu2 %v1381_v18  ;;  %v1406_v60 = vld [vmem:[#allocation5 + $0x160] sm:$0xff]  ;;  %v1397_v61 = vld [vmem:[#allocation5 + $0x118] sm:$0xff]  ;;  %v1029_v0 = vor.u32 %v1345_v57, %v1028_v56  ;;  %v1033_v1 = vor.u32 %v1342_v58, %v1030_v59  ;;  %v1396_v3 = vld [vmem:[#allocation5 + $0x110] sm:$0xff] }
  0x23   :  { %741 = vmatpush.bf16.msra.mxu3 %v1389_v19  ;;  %v1405_v2 = vld [vmem:[#allocation5 + $0x158] sm:$0xff]  ;;  %v1404_v4 = vld [vmem:[#allocation5 + $0x150] sm:$0xff]  ;;  %v1395_v5 = vld [vmem:[#allocation5 + $0x108] sm:$0xff] }
  0x24   :  { %655 = vmatpush.bf16.msra.mxu0 %v1364_v20  ;;  %v1403_v6 = vld [vmem:[#allocation5 + $0x148] sm:$0xff]  ;;  %v1394_v7 = vld [vmem:[#allocation5 + $0x100] sm:$0xff]  ;;  %v1048_v8 = vld [vmem:[#allocation2 + $0x70] sm:$0xf] }
  0x25   :  { %684 = vmatpush.bf16.msra.mxu1 %v1372_v21  ;;  %v1351_v9 = vld [vmem:[#allocation2 + $0x88] sm:$0xf0]  ;;  %v1348_v10 = vld [vmem:[#allocation2 + $0x74] sm:$0xf]  ;;  %v1050_v11 = vld [vmem:[#allocation2 + $0x8c] sm:$0xf0] }
  0x26   :  { %713 = vmatpush.bf16.msra.mxu2 %v1380_v22  ;;  %v1056_v12 = vld [vmem:[#allocation2 + $0x78] sm:$0xf]  ;;  %v1352_v13 = vld [vmem:[#allocation2 + $0x90] sm:$0xf0]  ;;  %v1349_v14 = vld [vmem:[#allocation2 + $0x7c] sm:$0xf]  ;;  %v1049_v17 = vor.u32 %v1351_v9, %v1048_v8  ;;  %v1053_v18 = vor.u32 %v1348_v10, %v1050_v11 }
  0x27   :  { %742 = vmatpush.bf16.msra.mxu3 %v1388_v23  ;;  %v1058_v15 = vld [vmem:[#allocation2 + $0x94] sm:$0xf0]  ;;  %v1402_v16 = vld [vmem:[#allocation5 + $0x140] sm:$0xff]  ;;  %v1057_v19 = vor.u32 %v1352_v13, %v1056_v12  ;;  %v1076_v21 = vld [vmem:[#allocation2 + $0xa8] sm:$0xf] }
  0x28   :  { %656 = vmatpush.bf16.msra.mxu0 %v1363_v24  ;;  %v1061_v20 = vor.u32 %v1349_v14, %v1058_v15  ;;  %v1358_v22 = vld [vmem:[#allocation2 + $0xc0] sm:$0xf0]  ;;  %v1355_v23 = vld [vmem:[#allocation2 + $0xac] sm:$0xf]  ;;  %v1078_v24 = vld [vmem:[#allocation2 + $0xc4] sm:$0xf0] }
  0x29   :  { %685 = vmatpush.bf16.msra.mxu1 %v1371_v25  ;;  %v1084_v25 = vld [vmem:[#allocation2 + $0xb0] sm:$0xf]  ;;  %v1339_v34 = vld [vmem:[#allocation2 + $0x28] sm:$0xf0]  ;;  %v1336_v35 = vld [vmem:[#allocation2 + $0x14] sm:$0xf] }
  0x2a   :  { %714 = vmatpush.bf16.msra.mxu2 %v1379_v26  ;;  %v1359_v26 = vld [vmem:[#allocation2 + $0xc8] sm:$0xf0]  ;;  %v1008_v33 = vld [vmem:[#allocation2 + $0x10] sm:$0xf]  ;;  %v1016_v37 = vld [vmem:[#allocation2 + $0x18] sm:$0xf] }
  0x2b   :  { %743 = vmatpush.bf16.msra.mxu3 %v1387_v27  ;;  %v1356_v27 = vld [vmem:[#allocation2 + $0xb4] sm:$0xf]  ;;  %v1010_v36 = vld [vmem:[#allocation2 + $0x2c] sm:$0xf0]  ;;  %v1009_v39 = vor.u32 %v1339_v34, %v1008_v33  ;;  %v1353_v52 = vld [vmem:[#allocation2 + $0x98] sm:$0xf0] }
  0x2c   :  { %657 = vmatpush.bf16.msra.mxu0 %v1362_v28  ;;  %v1086_v28 = vld [vmem:[#allocation2 + $0xcc] sm:$0xf0]  ;;  %v1340_v38 = vld [vmem:[#allocation2 + $0x30] sm:$0xf0]  ;;  %v1350_v53 = vld [vmem:[#allocation2 + $0x84] sm:$0xf] }
  0x2d   :  { %686 = vmatpush.bf16.msra.mxu1 %v1370_v29  ;;  %v1077_v29 = vor.u32 %v1358_v22, %v1076_v21  ;;  %v1089_v32 = vor.u32 %v1356_v27, %v1086_v28  ;;  %v1066_v54 = vld [vmem:[#allocation2 + $0x9c] sm:$0xf0]  ;;  %v1072_v55 = vld [vmem:[#allocation2 + $0x88] sm:$0xf]  ;;  %v1354_v56 = vld [vmem:[#allocation2 + $0xa0] sm:$0xf0] }
  0x2e   :  { %715 = vmatpush.bf16.msra.mxu2 %v1378_v30  ;;  %v1081_v30 = vor.u32 %v1355_v23, %v1078_v24  ;;  %v1069_v58 = vor.u32 %v1350_v53, %v1066_v54  ;;  %v1073_v59 = vor.u32 %v1354_v56, %v1072_v55  ;;  %v1416_v12 = vld [vmem:[#allocation7 + $0x28] sm:$0xff]  ;;  %v1414_v23 = vld [vmem:[#allocation7 + $0x18] sm:$0xff]  ;;  %v1413_v28 = vld [vmem:[#allocation7 + $0x10] sm:$0xff] }
  0x2f   :  { %744 = vmatpush.bf16.msra.mxu3 %v1386_v31  ;;  %658 = vmatmul.bf16.vlgmr.msra.gmra.mxu0 %v993_v42  ;;  %v1085_v31 = vor.u32 %v1359_v26, %v1084_v25  ;;  %v1036_v42 = vld [vmem:[#allocation2 + $0x48] sm:$0xf]  ;;  %v1412_v34 = vld [vmem:[#allocation7 + $0x8] sm:$0xff] }
  0x30   :  { %766 = vmatpush.bf16.msrb.mxu0 %v1401_v41  ;;  %687 = vmatmul.bf16.vlgmr.msra.gmra.mxu1 %v997_v43  ;;  %v1017_v41 = vor.u32 %v1340_v38, %v1016_v37  ;;  %v1346_v43 = vld [vmem:[#allocation2 + $0x60] sm:$0xf0] }
  0x31   :  { %716 = vmatmul.bf16.vlgmr.msra.gmra.mxu2 %v1001_v44  ;;  %795 = vmatpush.bf16.msrb.mxu1 %v1409_v46  ;;  %v1343_v44 = vld [vmem:[#allocation2 + $0x4c] sm:$0xf]  ;;  %v1044_v46 = vld [vmem:[#allocation2 + $0x50] sm:$0xf] }
  0x32   :  { %831 = vmatpush.bf16.msrb.mxu2 %v1410_v40  ;;  %745 = vmatmul.bf16.vlgmr.msra.gmra.mxu3 %v1005_v45  ;;  %v1013_v40 = vor.u32 %v1336_v35, %v1010_v36  ;;  %v1038_v45 = vld [vmem:[#allocation2 + $0x64] sm:$0xf0] }
  0x34   :  { %767 = vmatpush.bf16.msrb.mxu0 %v1400_v47  ;;  %v1347_v47 = vld [vmem:[#allocation2 + $0x68] sm:$0xf0] }
  0x35   :  { %796 = vmatpush.bf16.msrb.mxu1 %v1408_v48  ;;  %v1037_v48 = vor.u32 %v1346_v43, %v1036_v42 }
  0x38   :  { %768 = vmatpush.bf16.msrb.mxu0 %v1399_v49  ;;  %v1041_v49 = vor.u32 %v1343_v44, %v1038_v45 }
  0x39   :  { %797 = vmatpush.bf16.msrb.mxu1 %v1407_v50  ;;  %v1045_v50 = vor.u32 %v1347_v47, %v1044_v46 }
  0x3c   :  { %769 = vmatpush.bf16.msrb.mxu0 %v1398_v51  ;;  %v1064_v51 = vld [vmem:[#allocation2 + $0x80] sm:$0xf] }
  0x3d   :  { %798 = vmatpush.bf16.msrb.mxu1 %v1406_v60  ;;  %v1065_v57 = vor.u32 %v1353_v52, %v1064_v51  ;;  %v1092_v60 = vld [vmem:[#allocation2 + $0xb8] sm:$0xf] }
  0x3f   :  { %663 = vmatmul.bf16.gmra.mxu0 %v1021_v62  ;;  %v1357_v62 = vld [vmem:[#allocation2 + $0xbc] sm:$0xf] }
  0x40   :  { %770 = vmatpush.bf16.msrb.mxu0 %v1397_v61  ;;  %692 = vmatmul.bf16.gmra.mxu1 %v1025_v63  ;;  %v1360_v61 = vld [vmem:[#allocation2 + $0xd0] sm:$0xf0]  ;;  %v1094_v63 = vld [vmem:[#allocation2 + $0xd4] sm:$0xf0] }
  0x41   :  { %721 = vmatmul.bf16.gmra.mxu2 %v1029_v0  ;;  %799 = vmatpush.bf16.msrb.mxu1 %v1405_v2  ;;  %v1100_v0 = vld [vmem:[#allocation2 + $0xc0] sm:$0xf]  ;;  %v1093_v2 = vor.u32 %v1360_v61, %v1092_v60 }
  0x42   :  { %750 = vmatmul.bf16.gmra.mxu3 %v1033_v1  ;;  %v1361_v1 = vld [vmem:[#allocation2 + $0xd8] sm:$0xf0] }
  0x44   :  { %771 = vmatpush.bf16.msrb.mxu0 %v1396_v3  ;;  %v1097_v3 = vor.u32 %v1357_v62, %v1094_v63 }
  0x45   :  { %800 = vmatpush.bf16.msrb.mxu1 %v1404_v4  ;;  %v1101_v4 = vor.u32 %v1361_v1, %v1100_v0 }
  0x48   :  { %772 = vmatpush.bf16.msrb.mxu0 %v1395_v5  ;;  %v1418_v5 = vld [vmem:[#allocation7 + $0x38] sm:$0xff] }
  0x49   :  { %801 = vmatpush.bf16.msrb.mxu1 %v1403_v6  ;;  %933 = vmatpush.bf16.msrb.mxu3 %v1418_v5  ;;  %v1417_v6 = vld [vmem:[#allocation7 + $0x30] sm:$0xff] }
  0x4c   :  { %773 = vmatpush.bf16.msrb.mxu0 %v1394_v7  ;;  %v1589_v7 = vld [vmem:[%s1622_s2] ss:$0 sm:$0xff] }
  0x4d   :  { %802 = vmatpush.bf16.msrb.mxu1 %v1402_v16  ;;  %934 = vmatpush.bf16.msrb.mxu3 %v1417_v6 }
  0x4f   :  { %668 = vmatmul.bf16.gmra.mxu0 %v1049_v17  ;;  %v1415_v17 = vld [vmem:[#allocation7 + $0x20] sm:$0xff] }
  0x50   :  { %697 = vmatmul.bf16.gmra.mxu1 %v1053_v18 }
  0x51   :  { %726 = vmatmul.bf16.gmra.mxu2 %v1057_v19  ;;  %935 = vmatpush.bf16.msrb.mxu3 %v1416_v12 }
  0x52   :  { %755 = vmatmul.bf16.gmra.mxu3 %v1061_v20 }
  0x55   :  { %936 = vmatpush.bf16.msrb.mxu3 %v1415_v17 }
  0x59   :  { %937 = vmatpush.bf16.msrb.mxu3 %v1414_v23 }
  0x5d   :  { %938 = vmatpush.bf16.msrb.mxu3 %v1413_v28 }
  0x5f   :  { %673 = vmatmul.bf16.gmra.mxu0 %v1077_v29 }
  0x60   :  { %702 = vmatmul.bf16.gmra.mxu1 %v1081_v30 }
  0x61   :  { %731 = vmatmul.bf16.gmra.mxu2 %v1085_v31  ;;  %939 = vmatpush.bf16.msrb.mxu3 %v1412_v34 }
  0x62   :  { %760 = vmatmul.bf16.gmra.mxu3 %v1089_v32 }
  0x6f   :  { %774 = vmatmul.bf16.vlgmr.msrb.gmra.mxu0 %v1009_v39  ;;  %v1411_v39 = vld [vmem:[#allocation7] sm:$0xff] }
  0x70   :  { %803 = vmatmul.bf16.vlgmr.msrb.gmra.mxu1 %v1013_v40  ;;  %940 = vmatpush.bf16.msrb.mxu3 %v1411_v39 }
  0x71   :  { %1298 = vmatmul.msk.bf16.vlgmr.msrb.gmra.mxu2 %vm637_vm0, %v1017_v41 }
  0x7f   :  { %779 = vmatmul.bf16.gmra.mxu0 %v1037_v48 }
  0x80   :  { %808 = vmatmul.bf16.gmra.mxu1 %v1041_v49 }
  0x81   :  { %1299 = vmatmul.msk.bf16.gmra.mxu2 %vm637_vm0, %v1045_v50 }
  0x8f   :  { %784 = vmatmul.bf16.gmra.mxu0 %v1065_v57 }
  0x90   :  { %813 = vmatmul.bf16.gmra.mxu1 %v1069_v58 }
  0x91   :  { %1300 = vmatmul.msk.bf16.gmra.mxu2 %vm637_vm0, %v1073_v59 }
  0x9f   :  { %789 = vmatmul.bf16.gmra.mxu0 %v1093_v2 }
  0xa0   :  { %818 = vmatmul.bf16.gmra.mxu1 %v1097_v3 }
  0xa1   :  { %1301 = vmatmul.msk.bf16.gmra.mxu2 %vm637_vm0, %v1101_v4 }
  0xac   :  { %v659_v8 = vpop.f32.mrf.mxu0 }
  0xad   :  { %v688_v9 = vpop.f32.mrf.mxu1  ;;  %v660_v10 = vadd.f32 %v1589_v7, %v659_v8 }
  0xaf   :  { %v689_v11 = vadd.f32 %v688_v9, %v660_v10 }
  0xb4   :  { %v717_v13 = vpop.f32.mrf.mxu2  ;;  %v661_v15 = vpop.f32.mrf.mxu0 }
  0xb5   :  { %v718_v14 = vadd.f32 %v717_v13, %v689_v11  ;;  %v690_v16 = vpop.f32.mrf.mxu1  ;;  %v746_v40 = vpop.f32.mrf.mxu3  ;;  %v662_v51 = vadd.f32 %v1589_v7, %v661_v15 }
  0xb7   :  { %v691_v55 = vadd.f32 %v690_v16, %v662_v51  ;;  %v747_v58 = vadd.f32 %v746_v40, %v718_v14 }
  0xbc   :  { %v719_v18 = vpop.f32.mrf.mxu2  ;;  %v664_v19 = vpop.f32.mrf.mxu0 }
  0xbd   :  { %v693_v20 = vpop.f32.mrf.mxu1  ;;  %v665_v21 = vadd.f32 %v1589_v7, %v664_v19  ;;  %v748_v50 = vpop.f32.mrf.mxu3  ;;  %v720_v57 = vadd.f32 %v719_v18, %v691_v55 }
  0xbf   :  { %v694_v22 = vadd.f32 %v693_v20, %v665_v21  ;;  %v749_v60 = vadd.f32 %v748_v50, %v720_v57 }
  0xc4   :  { %v722_v24 = vpop.f32.mrf.mxu2  ;;  %v666_v26 = vpop.f32.mrf.mxu0 }
  0xc5   :  { %v723_v25 = vadd.f32 %v722_v24, %v694_v22  ;;  %v695_v27 = vpop.f32.mrf.mxu1  ;;  %v751_v56 = vpop.f32.mrf.mxu3  ;;  %v667_v3 = vadd.f32 %v1589_v7, %v666_v26 }
  0xc7   :  { %v696_v11 = vadd.f32 %v695_v27, %v667_v3  ;;  %v752_v16 = vadd.f32 %v751_v56, %v723_v25 }
  0xcc   :  { %v724_v29 = vpop.f32.mrf.mxu2  ;;  %v669_v30 = vpop.f32.mrf.mxu0 }
  0xcd   :  { %v698_v31 = vpop.f32.mrf.mxu1  ;;  %v670_v32 = vadd.f32 %v1589_v7, %v669_v30  ;;  %v753_v2 = vpop.f32.mrf.mxu3  ;;  %v725_v14 = vadd.f32 %v724_v29, %v696_v11 }
  0xcf   :  { %v699_v33 = vadd.f32 %v698_v31, %v670_v32  ;;  %v754_v19 = vadd.f32 %v753_v2, %v725_v14 }
  0xd4   :  { %v727_v35 = vpop.f32.mrf.mxu2  ;;  %v671_v37 = vpop.f32.mrf.mxu0 }
  0xd5   :  { %v1594_v36 = vadd.f32 %v727_v35, %v699_v33  ;;  %v700_v38 = vpop.f32.mrf.mxu1  ;;  %v756_v17 = vpop.f32.mrf.mxu3  ;;  %v672_v26 = vadd.f32 %v1589_v7, %v671_v37 }
  0xd7   :  { %v701_v34 = vadd.f32 %v700_v38, %v672_v26 }
  0xdc   :  { %v729_v41 = vpop.f32.mrf.mxu2  ;;  %v674_v42 = vpop.f32.mrf.mxu0 }
  0xdd   :  { %v703_v43 = vpop.f32.mrf.mxu1  ;;  %v675_v44 = vadd.f32 %v1589_v7, %v674_v42  ;;  %v758_v29 = vpop.f32.mrf.mxu3  ;;  %v730_v39 = vadd.f32 %v729_v41, %v701_v34  ;;  %v757_v42 = vadd.f32 %v756_v17, %v1594_v36 }
  0xdf   :  { %v704_v45 = vadd.f32 %v703_v43, %v675_v44  ;;  %v759_v44 = vadd.f32 %v758_v29, %v730_v39 }
  0xe4   :  { %v732_v46 = vpop.f32.mrf.mxu2  ;;  %v1599_v48 = vpop.f32.mrf.mxu0 }
  0xe5   :  { %v1597_v47 = vadd.f32 %v732_v46, %v704_v45  ;;  %v1601_v49 = vpop.f32.mrf.mxu1  ;;  %v761_v51 = vpop.f32.mrf.mxu3 }
  0xec   :  { %v1604_v52 = vpop.f32.mrf.mxu2  ;;  %v775_v53 = vpop.f32.mrf.mxu0 }
  0xed   :  { %v804_v54 = vpop.f32.mrf.mxu1  ;;  %v776_v61 = vadd.f32 %v775_v53, %v747_v58 }
  0xef   :  { %v805_v1 = vadd.f32 %v804_v54, %v776_v61  ;;  %v677_v54 = vadd.f32 %v1589_v7, %v1599_v48 }
  0xf1   :  { %v706_v58 = vadd.f32 %v1601_v49, %v677_v54 }
  0xf3   :  { %v735_v61 = vadd.f32 %v1604_v52, %v706_v58 }
  0xf4   :  { %v833_v59 = vpop.f32.mrf.mxu2  ;;  %v777_v62 = vpop.f32.mrf.mxu0 }
  0xf5   :  { %v806_v63 = vpop.f32.mrf.mxu1  ;;  %v778_v0 = vadd.f32 %v777_v62, %v749_v60  ;;  %v834_v4 = vadd.f32 %v833_v59, %v805_v1 }
  0xf7   :  { %v807_v5 = vadd.f32 %v806_v63, %v778_v0  ;;  %v853_v12 = vmax.f32 %v834_v4, 0.0  ;;  %v763_v63 = vpop.f32.mrf.mxu3  ;;  %v762_v0 = vadd.f32 %v761_v51, %v1597_v47  ;;  %v1430_v47 = vld [vmem:[%s1624_s4] ss:$0 sm:$0xff]  ;;  %s1540_s4 = smov [#allocation8]  }
  0xf8   :  { %v764_v2 = vadd.f32 %v763_v63, %v735_v61  ;;  %s974_s12 = sshll.u32 %s1540_s4, 4  ;;  %s975_s12 = int_to_ptr.vmem [resolvable:$true] %s974_s12 }
  0xfc   :  { %v835_v6 = vpop.f32.mrf.mxu2  ;;  %v780_v9 = vpop.f32.mrf.mxu0 }
  0xfd   :  { %v836_v8 = vadd.f32 %v835_v6, %v807_v5  ;;  %v809_v10 = vpop.f32.mrf.mxu1  ;;  %v781_v20 = vadd.f32 %v780_v9, %v752_v16 }
  0xff   :  { %v854_v13 = vmax.f32 %v836_v8, 0.0  ;;  %v810_v24 = vadd.f32 %v809_v10, %v781_v20 }
 0x101   :  { %v861_v15 = vpack.c.bf16 %v854_v13, %v853_v12 }
 0x103   :  { %941 = vmatmul.bf16.vlgmr.msrb.gmra.mxu3 %v861_v15 }
 0x104   :  { %v838_v18 = vpop.f32.mrf.mxu2  ;;  %v782_v21 = vpop.f32.mrf.mxu0 }
 0x105   :  { %v811_v22 = vpop.f32.mrf.mxu1  ;;  %v783_v23 = vadd.f32 %v782_v21, %v754_v19  ;;  %v839_v28 = vadd.f32 %v838_v18, %v810_v24 }
 0x107   :  { %v812_v30 = vadd.f32 %v811_v22, %v783_v23  ;;  %v855_v25 = vmax.f32 %v839_v28, 0.0 }
 0x10c   :  { %v840_v31 = vpop.f32.mrf.mxu2  ;;  %v785_v32 = vpop.f32.mrf.mxu0 }
 0x10d   :  { %v841_v27 = vadd.f32 %v840_v31, %v812_v30  ;;  %v814_v33 = vpop.f32.mrf.mxu1  ;;  %v786_v45 = vadd.f32 %v785_v32, %v757_v42 }
 0x10f   :  { %v856_v35 = vmax.f32 %v841_v27, 0.0  ;;  %v815_v53 = vadd.f32 %v814_v33, %v786_v45 }
 0x111   :  { %v862_v40 = vpack.c.bf16 %v856_v35, %v855_v25 }
 0x113   :  { %946 = vmatmul.bf16.gmra.mxu3 %v862_v40 }
 0x114   :  { %v843_v43 = vpop.f32.mrf.mxu2  ;;  %v787_v46 = vpop.f32.mrf.mxu0 }
 0x115   :  { %v816_v37 = vpop.f32.mrf.mxu1  ;;  %v788_v50 = vadd.f32 %v787_v46, %v759_v44  ;;  %v844_v55 = vadd.f32 %v843_v43, %v815_v53 }
 0x117   :  { %v817_v38 = vadd.f32 %v816_v37, %v788_v50  ;;  %v857_v36 = vmax.f32 %v844_v55, 0.0 }
 0x11c   :  { %v845_v56 = vpop.f32.mrf.mxu2  ;;  %v790_v41 = vpop.f32.mrf.mxu0 }
 0x11d   :  { %v846_v57 = vadd.f32 %v845_v56, %v817_v38  ;;  %v819_v60 = vpop.f32.mrf.mxu1  ;;  %v791_v7 = vadd.f32 %v790_v41, %v762_v0 }
 0x11f   :  { %v858_v59 = vmax.f32 %v846_v57, 0.0  ;;  %v820_v4 = vadd.f32 %v819_v60, %v791_v7 }
 0x121   :  { %v863_v62 = vpack.c.bf16 %v858_v59, %v857_v36 }
 0x123   :  { %951 = vmatmul.bf16.gmra.mxu3 %v863_v62 }
 0x124   :  { %v848_v1 = vpop.f32.mrf.mxu2  ;;  %v792_v48 = vpop.f32.mrf.mxu0 }
 0x125   :  { %v793_v3 = vadd.f32 %v792_v48, %v764_v2  ;;  %v821_v5 = vpop.f32.mrf.mxu1  ;;  %v849_v6 = vadd.f32 %v848_v1, %v820_v4 }
 0x127   :  { %v822_v8 = vadd.f32 %v821_v5, %v793_v3  ;;  %v859_v10 = vmax.f32 %v849_v6, 0.0 }
 0x12c   :  { %v850_v49 = vpop.f32.mrf.mxu2 }
 0x12d   :  { %v851_v9 = vadd.f32 %v850_v49, %v822_v8 }
 0x12f   :  { %v860_v11 = vmax.f32 %v851_v9, 0.0 }
 0x131   :  { %v864_v12 = vpack.c.bf16 %v860_v11, %v859_v10 }
 0x133   :  { %956 = vmatmul.bf16.gmra.mxu3 %v864_v12 }
 0x186   :  { %v942_v52 = vpop.f32.mrf.mxu3 }
 0x187   :  { %v943_v13 = vadd.f32 %v1430_v47, %v942_v52 }
 0x189   :  { %962 = vst [vmem:[#allocation8] sm:$0xff] %v943_v13 }
 0x18e   :  { %v944_v14 = vpop.f32.mrf.mxu3 }
 0x18f   :  { %v945_v15 = vadd.f32 %v1430_v47, %v944_v14 }
 0x191   :  { %963 = vst [vmem:[#allocation8 + $0x8] sm:$0xff] %v945_v15 }
 0x196   :  { %v947_v16 = vpop.f32.mrf.mxu3 }
 0x197   :  { %v948_v17 = vadd.f32 %v1430_v47, %v947_v16 }
 0x199   :  { %964 = vst [vmem:[#allocation8 + $0x10] sm:$0xff] %v948_v17 }
 0x19e   :  { %v949_v18 = vpop.f32.mrf.mxu3 }
 0x19f   :  { %v950_v19 = vadd.f32 %v1430_v47, %v949_v18 }
 0x1a1   :  { %965 = vst [vmem:[#allocation8 + $0x18] sm:$0xff] %v950_v19 }
 0x1a6   :  { %v952_v20 = vpop.f32.mrf.mxu3 }
 0x1a7   :  { %v953_v21 = vadd.f32 %v1430_v47, %v952_v20 }
 0x1a9   :  { %966 = vst [vmem:[#allocation8 + $0x20] sm:$0xff] %v953_v21 }
 0x1ae   :  { %v954_v22 = vpop.f32.mrf.mxu3 }
 0x1af   :  { %v955_v23 = vadd.f32 %v1430_v47, %v954_v22 }
 0x1b1   :  { %967 = vst [vmem:[#allocation8 + $0x28] sm:$0xff] %v955_v23 }
 0x1b6   :  { %v957_v24 = vpop.f32.mrf.mxu3 }
 0x1b7   :  { %v958_v26 = vadd.f32 %v1430_v47, %v957_v24 }
 0x1b9   :  { %968 = vst [vmem:[#allocation8 + $0x30] sm:$0xff] %v958_v26 }
 0x1be   :  { %v959_v28 = vpop.f32.mrf.mxu3 }
 0x1bf   :  { %v960_v30 = vadd.f32 %v1430_v47, %v959_v28 }
 0x1c1   :  { %969 = vst [vmem:[#allocation8 + $0x38] sm:$0xff] %v960_v30 }
 0x1c2   :  { %982 = dma.vmem_to_hbm [thread:$0]  %s975_s12, 1024, %s977_s15, [#allocation4], %s1541_s16, %s1541_s16, %s1542_s17  }
 0x1c3   :  { %1531 = dma.done.wait [#allocation4], 1024  }
 0x1c4   :  { %1532 = vsyncadd [#allocation4], 4294966272 }
 0x1c5   :  { %987 = vsyncpa [#allocation3], 1 }
 0x1c6   :  { %988 = vsyncpa [#allocation6], 1 }
 0x1c7   :  { %989 = vsyncpa [#allocation4], 1 }

</bundles_post_ra>
